<compile_context>
chip_gen: v7x
topology: tpu7x:2x2x1
jax: 0.10.0
libtpu: 0.0.40
codegen_flags: <defaults>
</compile_context>

<pallas_src>
import functools
import math

import jax
import jax.numpy as jnp
from jax import lax
from jax.experimental import pallas as pl
from jax.experimental.pallas import tpu as pltpu


def _attention_head_kernel(q_ref, k_ref, v_ref,
                           wq_ref, bq_ref, wk_ref, bk_ref,
                           wv_ref, bv_ref, wo_ref, bo_ref,
                           o_ref, acc_ref, *, L, S, compute_dtype):
    """One grid step = (one block of Bb batch elements) x (one head)."""
    h = pl.program_id(1)
    n_heads = pl.num_programs(1)

    rows_q = q_ref.shape[0]
    Bb = rows_q // L
    d_keys = wq_ref.shape[-1]
    d_values = wv_ref.shape[-1]

    # Per-head projections: tall (Bb*L, D)/(Bb*S, D) row blocks against this
    # head's (D, dk)/(D, dv) weight tile, f32 accumulation on the MXU.
    # The 1/sqrt(dk) softmax scale is folded into wq / bq in the wrapper.
    Qh = jnp.dot(q_ref[...], wq_ref[...],
                 preferred_element_type=jnp.float32) + bq_ref[...]
    Kh = jnp.dot(k_ref[...], wk_ref[...],
                 preferred_element_type=jnp.float32) + bk_ref[...]
    Vh = jnp.dot(v_ref[...], wv_ref[...],
                 preferred_element_type=jnp.float32) + bv_ref[...]

    Qb = Qh.reshape(Bb, L, d_keys).astype(compute_dtype)
    Kb = Kh.reshape(Bb, S, d_keys).astype(compute_dtype)
    Vb = Vh.reshape(Bb, S, d_values).astype(compute_dtype)

    # scores (Bb, L, S): canonical leading-batch dot_general (scale pre-folded).
    s = lax.dot_general(Qb, Kb, (((2,), (2,)), ((0,), (0,))),
                        preferred_element_type=jnp.float32)
    m = jnp.max(s, axis=-1, keepdims=True)
    p = jnp.exp(s - m)
    denom = jnp.sum(p, axis=-1, keepdims=True)
    A = (p * pl.reciprocal(denom, approx=True)).astype(compute_dtype)

    # ctx (Bb, L, dv) = A @ V (leading-batch dot_general).
    ctx = lax.dot_general(A, Vb, (((2,), (1,)), ((0,), (0,))),
                          preferred_element_type=jnp.float32)

    # This head's contribution to the output projection.
    contrib = jnp.dot(ctx.reshape(Bb * L, d_values).astype(compute_dtype),
                      wo_ref[...], preferred_element_type=jnp.float32)

    @pl.when(h == 0)
    def _():
        acc_ref[...] = jnp.zeros_like(acc_ref)

    acc_ref[...] += contrib

    @pl.when(h == n_heads - 1)
    def _():
        o_ref[...] = (acc_ref[...] + bo_ref[...]).astype(o_ref.dtype)


def _vmem_capacity_bytes():
    try:
        return int(pltpu.get_tpu_info().vmem_capacity_bytes)
    except Exception:
        return 64 << 20  # conservative fallback (v7x-sized VMEM)


def _pick_batch_block(B, L, S, D, dk, dv, d_model, in_bytes, out_bytes, budget):
    """Largest divisor Bb of B whose per-step working set fits the budget,
    preferring >= 2 batch blocks so the 'parallel' batch axis can be sharded
    across v7x's two TensorCores (harmless extra grid steps on v5e/v6e)."""

    def legal(bb):
        # row (sublane) dim of the 2D blocks must be a multiple of 8 or full.
        return bb == B or ((bb * L) % 8 == 0 and (bb * S) % 8 == 0)

    def estimate(bb):
        rq, rk = bb * L, bb * S
        est = 2 * in_bytes * (rq + 2 * rk) * D                       # dbl-buffered q/k/v blocks
        est += 2 * in_bytes * (2 * D * dk + D * dv + dv * d_model)   # dbl-buffered per-head weights
        est += 4 * (rq * dk + rk * (dk + dv))                        # f32 Q/K/V (one head)
        est += 4 * 2 * bb * L * S                                    # scores + probs
        est += 4 * rq * dv                                           # ctx
        est += 4 * 2 * rq * d_model                                  # contrib + acc scratch
        est += 2 * out_bytes * rq * d_model                          # dbl-buffered output block
        return est

    divisors = [d for d in range(1, B + 1) if B % d == 0 and legal(d)]
    fitting = [d for d in divisors if estimate(d) <= budget]
    multi = [d for d in fitting if B // d >= 2]
    if multi:
        return max(multi)
    if fitting:
        return max(fitting)
    return divisors[0] if divisors else B


def attention_layer(queries, keys, values, params, n_heads, *, compute_dtype=None):
    """Pallas forward of AttentionLayer. queries: (B,L,D); keys/values: (B,S,D).

    Returns (out, None) like the PyTorch module (output_attention=False).
    compute_dtype defaults to bfloat16 for f32 inputs (bf16 MXU operands are
    supported on v5e/v6e/v7x); accumulation and softmax stats stay f32.
    """
    wq, bq, wk, bk, wv, bv, wo, bo = params
    B, L, D = queries.shape
    _, S, _ = keys.shape
    HDk, HDv = wq.shape[0], wv.shape[0]
    d_keys, d_values = HDk // n_heads, HDv // n_heads
    d_model = wo.shape[0]
    out_dtype = queries.dtype

    if compute_dtype is None:
        compute_dtype = jnp.bfloat16 if queries.dtype == jnp.float32 else queries.dtype
    cdt = compute_dtype

    if S == 0:
        # Degenerate branch from the reference forward (plain JAX glue).
        q_proj = queries @ wq.T + bq.reshape(-1)
        return q_proj @ wo.T + bo.reshape(-1), None

    scale = 1.0 / math.sqrt(d_keys)

    # One-time wrapper-side prep: head-major weight layouts so each head's tile
    # is a full-last-two-dims BlockSpec block; softmax scale folded into the
    # query projection; biases kept in f32.  (The raw q/k/v cast to cdt here is
    # numerically identical to casting in-kernel right before the MXU dot, and
    # halves the input DMA bytes.)
    wq3 = (wq * scale).reshape(n_heads, d_keys, D).transpose(0, 2, 1).astype(cdt)
    wk3 = wk.reshape(n_heads, d_keys, D).transpose(0, 2, 1).astype(cdt)
    wv3 = wv.reshape(n_heads, d_values, D).transpose(0, 2, 1).astype(cdt)
    wo3 = wo.T.reshape(n_heads, d_values, d_model).astype(cdt)
    bq3 = (bq.reshape(n_heads, 1, d_keys) * scale).astype(jnp.float32)
    bk3 = bk.reshape(n_heads, 1, d_keys).astype(jnp.float32)
    bv3 = bv.reshape(n_heads, 1, d_values).astype(jnp.float32)
    bo2 = bo.reshape(1, d_model).astype(jnp.float32)

    # Flattened, lane/sublane-dense 2D tensor I/O.
    q2 = queries.reshape(B * L, D).astype(cdt)
    k2 = keys.reshape(B * S, D).astype(cdt)
    v2 = values.reshape(B * S, D).astype(cdt)

    cap = _vmem_capacity_bytes()
    budget = int(cap * 0.55)                      # headroom for compiler scratch
    vmem_limit = (int(cap * 0.70) >> 20) << 20    # e.g. ~45 MiB on v7x, ~89 MiB on v5e/v6e
    in_bytes = jnp.dtype(cdt).itemsize
    out_bytes = jnp.dtype(out_dtype).itemsize
    Bb = _pick_batch_block(B, L, S, D, d_keys, d_values, d_model,
                           in_bytes, out_bytes, budget)
    grid = (B // Bb, n_heads)

    kernel = functools.partial(_attention_head_kernel,
                               L=L, S=S, compute_dtype=cdt)

    def rows(block_rows):
        # block index constant across h -> the q/k/v block is DMA'd once per i.
        return pl.BlockSpec((block_rows, D), lambda i, h: (i, 0))

    def per_head(arr):
        _, a, b = arr.shape
        return pl.BlockSpec((None, a, b), lambda i, h: (h, 0, 0))

    out = pl.pallas_call(
        kernel,
        out_shape=jax.ShapeDtypeStruct((B * L, d_model), out_dtype),
        grid_spec=pltpu.PrefetchScalarGridSpec(
            num_scalar_prefetch=0,
            grid=grid,
            in_specs=[
                rows(Bb * L),                 # queries rows
                rows(Bb * S),                 # keys rows
                rows(Bb * S),                 # values rows
                per_head(wq3), per_head(bq3),
                per_head(wk3), per_head(bk3),
                per_head(wv3), per_head(bv3),
                per_head(wo3),
                # bo is the only fully grid-invariant input and is tiny, so
                # default double-buffering costs nothing.
                pl.BlockSpec((1, d_model), lambda i, h: (0, 0)),
            ],
            out_specs=pl.BlockSpec((Bb * L, d_model), lambda i, h: (i, 0)),
            scratch_shapes=[pltpu.VMEM((Bb * L, d_model), jnp.float32)],
        ),
        compiler_params=pltpu.CompilerParams(
            dimension_semantics=("parallel", "arbitrary"),
            vmem_limit_bytes=vmem_limit),
    )(q2, k2, v2, wq3, bq3, wk3, bk3, wv3, bv3, wo3, bo2)

    return out.reshape(B, L, d_model), None  # attn is None (output_attention=False)


def _reference(queries, keys, values, params, n_heads):
    """Pure-JAX reference mirroring the PyTorch forward (FullAttention, no mask)."""
    wq, bq, wk, bk, wv, bv, wo, bo = params
    B, L, _ = queries.shape
    _, S, _ = keys.shape
    dk = wq.shape[0] // n_heads
    dv = wv.shape[0] // n_heads
    Q = (queries @ wq.T + bq.reshape(-1)).reshape(B, L, n_heads, dk)
    K = (keys @ wk.T + bk.reshape(-1)).reshape(B, S, n_heads, dk)
    V = (values @ wv.T + bv.reshape(-1)).reshape(B, S, n_heads, dv)
    scores = jnp.einsum("blhe,bshe->bhls", Q, K) / math.sqrt(dk)
    A = jax.nn.softmax(scores, axis=-1)
    out = jnp.einsum("bhls,bshd->blhd", A, V).reshape(B, L, n_heads * dv)
    return out @ wo.T + bo.reshape(-1)


if __name__ == "__main__":
    B, L, S = 2, 8, 16
    d_model, n_heads = 32, 4
    d_keys = d_model // n_heads
    d_values = d_model // n_heads

    key = jax.random.PRNGKey(0)
    ks = jax.random.split(key, 11)

    def lin_init(kw, kb, out_f, in_f):
        bound = 1.0 / math.sqrt(in_f)
        w = jax.random.uniform(kw, (out_f, in_f), jnp.float32, -bound, bound)
        b = jax.random.uniform(kb, (1, out_f), jnp.float32, -bound, bound)
        return w, b

    wq, bq = lin_init(ks[0], ks[1], d_keys * n_heads, d_model)
    wk, bk = lin_init(ks[2], ks[3], d_keys * n_heads, d_model)
    wv, bv = lin_init(ks[4], ks[5], d_values * n_heads, d_model)
    wo, bo = lin_init(ks[6], ks[7], d_model, d_values * n_heads)
    params = (wq, bq, wk, bk, wv, bv, wo, bo)

    queries = jax.random.normal(ks[8], (B, L, d_model), jnp.float32)
    keys = jax.random.normal(ks[9], (B, S, d_model), jnp.float32)
    values = jax.random.normal(ks[10], (B, S, d_model), jnp.float32)

    ref = _reference(queries, keys, values, params, n_heads)

    # Full-precision path (f32 MXU operands); tolerance covers approx recip.
    out_f32, attn = attention_layer(queries, keys, values, params, n_heads,
                                    compute_dtype=jnp.float32)
    out_f32 = jax.block_until_ready(out_f32)
    assert out_f32.shape == (B, L, d_model)
    assert attn is None
    assert jnp.allclose(out_f32, ref, atol=5e-3, rtol=5e-3), "f32 path mismatch"

    # Default path (bf16 MXU operands, f32 accumulation): looser tolerance.
    out_bf16, _ = attention_layer(queries, keys, values, params, n_heads)
    out_bf16 = jax.block_until_ready(out_bf16)
    assert out_bf16.shape == (B, L, d_model)
    assert jnp.allclose(out_bf16, ref, atol=5e-2, rtol=5e-2), "bf16 path mismatch"

    print("KERNEL_OK")
</pallas_src>

<mosaic_0001>
module attributes {stable_mosaic.version = 11 : i64} {
  func.func @_attention_head_kernel(%arg0: i32, %arg1: i32, %arg2: memref<8x32xf32, #tpu.memory_space<vmem>>, %arg3: memref<16x32xf32, #tpu.memory_space<vmem>>, %arg4: memref<16x32xf32, #tpu.memory_space<vmem>>, %arg5: memref<1x32x8xf32, #tpu.memory_space<vmem>>, %arg6: memref<1x1x8xf32, #tpu.memory_space<vmem>>, %arg7: memref<1x32x8xf32, #tpu.memory_space<vmem>>, %arg8: memref<1x1x8xf32, #tpu.memory_space<vmem>>, %arg9: memref<1x32x8xf32, #tpu.memory_space<vmem>>, %arg10: memref<1x1x8xf32, #tpu.memory_space<vmem>>, %arg11: memref<1x8x32xf32, #tpu.memory_space<vmem>>, %arg12: memref<1x32xf32, #tpu.memory_space<vmem>>, %arg13: memref<8x32xf32, #tpu.memory_space<vmem>>, %arg14: memref<8x32xf32, #tpu.memory_space<vmem>>) attributes {dimension_semantics = [#tpu.dimension_semantics<parallel>, #tpu.dimension_semantics<arbitrary>], iteration_bounds = array<i64: 2, 4>, scalar_prefetch = 0 : i64, scratch_operands = 1 : i64, tpu.core_type = #tpu.core_type<tc>, window_params = [{transform_indices = @transform_0, window_bounds = array<i64: 8, 32>}, {transform_indices = @transform_1, window_bounds = array<i64: 16, 32>}, {transform_indices = @transform_2, window_bounds = array<i64: 16, 32>}, {transform_indices = @transform_3, window_bounds = array<i64: 1, 32, 8>}, {transform_indices = @transform_4, window_bounds = array<i64: 1, 1, 8>}, {transform_indices = @transform_5, window_bounds = array<i64: 1, 32, 8>}, {transform_indices = @transform_6, window_bounds = array<i64: 1, 1, 8>}, {transform_indices = @transform_7, window_bounds = array<i64: 1, 32, 8>}, {transform_indices = @transform_8, window_bounds = array<i64: 1, 1, 8>}, {transform_indices = @transform_9, window_bounds = array<i64: 1, 8, 32>}, {pipeline_mode = #tpu.pipeline_mode<synchronous>, transform_indices = @transform_10, window_bounds = array<i64: 1, 32>}, {transform_indices = @transform_11, window_bounds = array<i64: 8, 32>}]} {
    %c0 = arith.constant 0 : index
    %c0_0 = arith.constant 0 : index
    %0 = vector.load %arg2[%c0, %c0_0] : memref<8x32xf32, #tpu.memory_space<vmem>>, vector<8x32xf32>
    %c0_1 = arith.constant 0 : index
    %c0_2 = arith.constant 0 : index
    %c0_3 = arith.constant 0 : index
    %1 = vector.load %arg5[%c0_1, %c0_2, %c0_3] : memref<1x32x8xf32, #tpu.memory_space<vmem>>, vector<1x32x8xf32>
    %2 = vector.shape_cast %1 : vector<1x32x8xf32> to vector<32x8xf32>
    %cst = arith.constant dense<0.000000e+00> : vector<8x8xf32>
    %3 = tpu.matmul %0, %2, %cst {dimension_numbers = #tpu.dot_dimension_numbers<[1], [0], [0], [1], [0, 0, 1, 1], [], []>} : vector<8x32xf32>, vector<32x8xf32>, vector<8x8xf32> -> vector<8x8xf32>
    %c0_4 = arith.constant 0 : index
    %c0_5 = arith.constant 0 : index
    %c0_6 = arith.constant 0 : index
    %4 = vector.load %arg6[%c0_4, %c0_5, %c0_6] : memref<1x1x8xf32, #tpu.memory_space<vmem>>, vector<1x1x8xf32>
    %5 = vector.shape_cast %4 : vector<1x1x8xf32> to vector<1x8xf32>
    %6 = vector.broadcast %5 : vector<1x8xf32> to vector<8x8xf32>
    %7 = arith.addf %3, %6 : vector<8x8xf32>
    %c0_7 = arith.constant 0 : index
    %c0_8 = arith.constant 0 : index
    %8 = vector.load %arg3[%c0_7, %c0_8] : memref<16x32xf32, #tpu.memory_space<vmem>>, vector<16x32xf32>
    %c0_9 = arith.constant 0 : index
    %c0_10 = arith.constant 0 : index
    %c0_11 = arith.constant 0 : index
    %9 = vector.load %arg7[%c0_9, %c0_10, %c0_11] : memref<1x32x8xf32, #tpu.memory_space<vmem>>, vector<1x32x8xf32>
    %10 = vector.shape_cast %9 : vector<1x32x8xf32> to vector<32x8xf32>
    %cst_12 = arith.constant dense<0.000000e+00> : vector<16x8xf32>
    %11 = tpu.matmul %8, %10, %cst_12 {dimension_numbers = #tpu.dot_dimension_numbers<[1], [0], [0], [1], [0, 0, 1, 1], [], []>} : vector<16x32xf32>, vector<32x8xf32>, vector<16x8xf32> -> vector<16x8xf32>
    %c0_13 = arith.constant 0 : index
    %c0_14 = arith.constant 0 : index
    %c0_15 = arith.constant 0 : index
    %12 = vector.load %arg8[%c0_13, %c0_14, %c0_15] : memref<1x1x8xf32, #tpu.memory_space<vmem>>, vector<1x1x8xf32>
    %13 = vector.shape_cast %12 : vector<1x1x8xf32> to vector<1x8xf32>
    %14 = vector.broadcast %13 : vector<1x8xf32> to vector<16x8xf32>
    %15 = arith.addf %11, %14 : vector<16x8xf32>
    %c0_16 = arith.constant 0 : index
    %c0_17 = arith.constant 0 : index
    %16 = vector.load %arg4[%c0_16, %c0_17] : memref<16x32xf32, #tpu.memory_space<vmem>>, vector<16x32xf32>
    %c0_18 = arith.constant 0 : index
    %c0_19 = arith.constant 0 : index
    %c0_20 = arith.constant 0 : index
    %17 = vector.load %arg9[%c0_18, %c0_19, %c0_20] : memref<1x32x8xf32, #tpu.memory_space<vmem>>, vector<1x32x8xf32>
    %18 = vector.shape_cast %17 : vector<1x32x8xf32> to vector<32x8xf32>
    %cst_21 = arith.constant dense<0.000000e+00> : vector<16x8xf32>
    %19 = tpu.matmul %16, %18, %cst_21 {dimension_numbers = #tpu.dot_dimension_numbers<[1], [0], [0], [1], [0, 0, 1, 1], [], []>} : vector<16x32xf32>, vector<32x8xf32>, vector<16x8xf32> -> vector<16x8xf32>
    %c0_22 = arith.constant 0 : index
    %c0_23 = arith.constant 0 : index
    %c0_24 = arith.constant 0 : index
    %20 = vector.load %arg10[%c0_22, %c0_23, %c0_24] : memref<1x1x8xf32, #tpu.memory_space<vmem>>, vector<1x1x8xf32>
    %21 = vector.shape_cast %20 : vector<1x1x8xf32> to vector<1x8xf32>
    %22 = vector.broadcast %21 : vector<1x8xf32> to vector<16x8xf32>
    %23 = arith.addf %19, %22 : vector<16x8xf32>
    %24 = vector.shape_cast %7 : vector<8x8xf32> to vector<1x8x8xf32>
    %25 = vector.shape_cast %15 : vector<16x8xf32> to vector<1x16x8xf32>
    %26 = vector.shape_cast %23 : vector<16x8xf32> to vector<1x16x8xf32>
    %cst_25 = arith.constant dense<0.000000e+00> : vector<1x8x16xf32>
    %27 = tpu.matmul %24, %25, %cst_25 {dimension_numbers = #tpu.dot_dimension_numbers<[2], [2], [1], [1], [0, 0, 0, 1, 1, 1], [0], [0]>} : vector<1x8x8xf32>, vector<1x16x8xf32>, vector<1x8x16xf32> -> vector<1x8x16xf32>
    %cst_26 = arith.constant dense<0xFF800000> : vector<1x8xf32>
    %28 = vector.multi_reduction <maximumf>, %27, %cst_26 [2] : vector<1x8x16xf32> to vector<1x8xf32>
    %29 = vector.shape_cast %28 : vector<1x8xf32> to vector<1x8x1xf32>
    %30 = vector.broadcast %29 : vector<1x8x1xf32> to vector<1x8x16xf32>
    %31 = arith.subf %27, %30 : vector<1x8x16xf32>
    %32 = math.exp %31 : vector<1x8x16xf32>
    %cst_27 = arith.constant dense<0.000000e+00> : vector<1x8xf32>
    %33 = vector.multi_reduction <add>, %32, %cst_27 [2] : vector<1x8x16xf32> to vector<1x8xf32>
    %34 = vector.shape_cast %33 : vector<1x8xf32> to vector<1x8x1xf32>
    %35 = tpu.reciprocal %34 {approx = true} : vector<1x8x1xf32> -> vector<1x8x1xf32>
    %36 = vector.broadcast %35 : vector<1x8x1xf32> to vector<1x8x16xf32>
    %37 = arith.mulf %32, %36 : vector<1x8x16xf32>
    %cst_28 = arith.constant dense<0.000000e+00> : vector<1x8x8xf32>
    %38 = tpu.matmul %37, %26, %cst_28 {dimension_numbers = #tpu.dot_dimension_numbers<[2], [1], [1], [2], [0, 0, 0, 1, 1, 2], [0], [0]>} : vector<1x8x16xf32>, vector<1x16x8xf32>, vector<1x8x8xf32> -> vector<1x8x8xf32>
    %39 = vector.shape_cast %38 : vector<1x8x8xf32> to vector<8x8xf32>
    %c0_29 = arith.constant 0 : index
    %c0_30 = arith.constant 0 : index
    %c0_31 = arith.constant 0 : index
    %40 = vector.load %arg11[%c0_29, %c0_30, %c0_31] : memref<1x8x32xf32, #tpu.memory_space<vmem>>, vector<1x8x32xf32>
    %41 = vector.shape_cast %40 : vector<1x8x32xf32> to vector<8x32xf32>
    %cst_32 = arith.constant dense<0.000000e+00> : vector<8x32xf32>
    %42 = tpu.matmul %39, %41, %cst_32 {dimension_numbers = #tpu.dot_dimension_numbers<[1], [0], [0], [1], [0, 0, 1, 1], [], []>} : vector<8x8xf32>, vector<8x32xf32>, vector<8x32xf32> -> vector<8x32xf32>
    %c0_i32 = arith.constant 0 : i32
    %43 = arith.cmpi eq, %arg1, %c0_i32 : i32
    %44 = arith.extui %43 : i1 to i32
    %c0_i32_33 = arith.constant 0 : i32
    %45 = arith.cmpi ne, %44, %c0_i32_33 : i32
    scf.if %45 {
      %cst_39 = arith.constant 0.000000e+00 : f32
      %52 = vector.broadcast %cst_39 : f32 to vector<8x32xf32>
      %c0_40 = arith.constant 0 : index
      %c0_41 = arith.constant 0 : index
      %53 = vector.load %arg14[%c0_40, %c0_41] : memref<8x32xf32, #tpu.memory_space<vmem>>, vector<8x32xf32>
      tpu.vector_store %arg14[%c0_40, %c0_41], %52 {strides = array<i32>} : memref<8x32xf32, #tpu.memory_space<vmem>>, vector<8x32xf32>,
    } else {
    }
    %c0_34 = arith.constant 0 : index
    %c0_35 = arith.constant 0 : index
    %46 = vector.load %arg14[%c0_34, %c0_35] : memref<8x32xf32, #tpu.memory_space<vmem>>, vector<8x32xf32>
    %47 = arith.addf %46, %42 : vector<8x32xf32>
    %c0_36 = arith.constant 0 : index
    %c0_37 = arith.constant 0 : index
    %48 = vector.load %arg14[%c0_36, %c0_37] : memref<8x32xf32, #tpu.memory_space<vmem>>, vector<8x32xf32>
    tpu.vector_store %arg14[%c0_36, %c0_37], %47 {strides = array<i32>} : memref<8x32xf32, #tpu.memory_space<vmem>>, vector<8x32xf32>,
    %c3_i32 = arith.constant 3 : i32
    %49 = arith.cmpi eq, %arg1, %c3_i32 : i32
    %50 = arith.extui %49 : i1 to i32
    %c0_i32_38 = arith.constant 0 : i32
    %51 = arith.cmpi ne, %50, %c0_i32_38 : i32
    scf.if %51 {
      %c0_39 = arith.constant 0 : index
      %c0_40 = arith.constant 0 : index
      %52 = vector.load %arg14[%c0_39, %c0_40] : memref<8x32xf32, #tpu.memory_space<vmem>>, vector<8x32xf32>
      %c0_41 = arith.constant 0 : index
      %c0_42 = arith.constant 0 : index
      %53 = vector.load %arg12[%c0_41, %c0_42] : memref<1x32xf32, #tpu.memory_space<vmem>>, vector<1x32xf32>
      %54 = vector.broadcast %53 : vector<1x32xf32> to vector<8x32xf32>
      %55 = arith.addf %52, %54 : vector<8x32xf32>
      %c0_43 = arith.constant 0 : index
      %c0_44 = arith.constant 0 : index
      %56 = vector.load %arg13[%c0_43, %c0_44] : memref<8x32xf32, #tpu.memory_space<vmem>>, vector<8x32xf32>
      tpu.vector_store %arg13[%c0_43, %c0_44], %55 {strides = array<i32>} : memref<8x32xf32, #tpu.memory_space<vmem>>, vector<8x32xf32>,
    } else {
    }
    return
  }
  func.func @transform_0(%arg0: i32, %arg1: i32) -> (i32, i32) {
    %c0_i32 = arith.constant 0 : i32
    %c0_i32_0 = arith.constant 0 : i32
    return %arg0, %c0_i32 : i32, i32
  }
  func.func @transform_1(%arg0: i32, %arg1: i32) -> (i32, i32) {
    %c0_i32 = arith.constant 0 : i32
    %c0_i32_0 = arith.constant 0 : i32
    return %arg0, %c0_i32 : i32, i32
  }
  func.func @transform_2(%arg0: i32, %arg1: i32) -> (i32, i32) {
    %c0_i32 = arith.constant 0 : i32
    %c0_i32_0 = arith.constant 0 : i32
    return %arg0, %c0_i32 : i32, i32
  }
  func.func @transform_3(%arg0: i32, %arg1: i32) -> (i32, i32, i32) {
    %c0_i32 = arith.constant 0 : i32
    %c0_i32_0 = arith.constant 0 : i32
    %c0_i32_1 = arith.constant 0 : i32
    return %arg1, %c0_i32, %c0_i32_0 : i32, i32, i32
  }
  func.func @transform_4(%arg0: i32, %arg1: i32) -> (i32, i32, i32) {
    %c0_i32 = arith.constant 0 : i32
    %c0_i32_0 = arith.constant 0 : i32
    %c0_i32_1 = arith.constant 0 : i32
    return %arg1, %c0_i32, %c0_i32_0 : i32, i32, i32
  }
  func.func @transform_5(%arg0: i32, %arg1: i32) -> (i32, i32, i32) {
    %c0_i32 = arith.constant 0 : i32
    %c0_i32_0 = arith.constant 0 : i32
    %c0_i32_1 = arith.constant 0 : i32
    return %arg1, %c0_i32, %c0_i32_0 : i32, i32, i32
  }
  func.func @transform_6(%arg0: i32, %arg1: i32) -> (i32, i32, i32) {
    %c0_i32 = arith.constant 0 : i32
    %c0_i32_0 = arith.constant 0 : i32
    %c0_i32_1 = arith.constant 0 : i32
    return %arg1, %c0_i32, %c0_i32_0 : i32, i32, i32
  }
  func.func @transform_7(%arg0: i32, %arg1: i32) -> (i32, i32, i32) {
    %c0_i32 = arith.constant 0 : i32
    %c0_i32_0 = arith.constant 0 : i32
    %c0_i32_1 = arith.constant 0 : i32
    return %arg1, %c0_i32, %c0_i32_0 : i32, i32, i32
  }
  func.func @transform_8(%arg0: i32, %arg1: i32) -> (i32, i32, i32) {
    %c0_i32 = arith.constant 0 : i32
    %c0_i32_0 = arith.constant 0 : i32
    %c0_i32_1 = arith.constant 0 : i32
    return %arg1, %c0_i32, %c0_i32_0 : i32, i32, i32
  }
  func.func @transform_9(%arg0: i32, %arg1: i32) -> (i32, i32, i32) {
    %c0_i32 = arith.constant 0 : i32
    %c0_i32_0 = arith.constant 0 : i32
    %c0_i32_1 = arith.constant 0 : i32
    return %arg1, %c0_i32, %c0_i32_0 : i32, i32, i32
  }
  func.func @transform_10(%arg0: i32, %arg1: i32) -> (i32, i32) {
    %c0_i32 = arith.constant 0 : i32
    %c0_i32_0 = arith.constant 0 : i32
    %c0_i32_1 = arith.constant 0 : i32
    return %c0_i32, %c0_i32_0 : i32, i32
  }
  func.func @transform_11(%arg0: i32, %arg1: i32) -> (i32, i32) {
    %c0_i32 = arith.constant 0 : i32
    %c0_i32_0 = arith.constant 0 : i32
    return %arg0, %c0_i32 : i32, i32
  }
}

</mosaic_0001>

<bundles_post_ra>
// kernel: tpu_custom_call.1
= control target key start
LH: loop header
LB: loop body
LE: loop exit
PB: predicated region body
PF: predicated region fallthrough
CT: control target
= control target key end

     0   :  { %16 = vsyncpa [#allocation4], 0  ;;  %s1877_s0 = inlined_call_operand.vmem [shape: f32[16,32], index: 0, kind: input, shape index: {}]   ;;  %s1878_s1 = inlined_call_operand.vmem [shape: f32[32,32], index: 1, kind: input, shape index: {}]   ;;  %s1879_s2 = inlined_call_operand.vmem [shape: f32[32,32], index: 2, kind: input, shape index: {}]   ;;  %s1880_s3 = inlined_call_operand.vmem [shape: f32[4,32,8], index: 3, kind: input, shape index: {}]   ;;  %s1881_s4 = inlined_call_operand.vmem [shape: f32[4,1,8], index: 4, kind: input, shape index: {}]   ;;  %s1882_s5 = inlined_call_operand.vmem [shape: f32[4,32,8], index: 5, kind: input, shape index: {}]   ;;  %s1883_s6 = inlined_call_operand.vmem [shape: f32[4,1,8], index: 6, kind: input, shape index: {}]   ;;  %s1884_s7 = inlined_call_operand.vmem [shape: f32[4,32,8], index: 7, kind: input, shape index: {}]   ;;  %s1885_s8 = inlined_call_operand.vmem [shape: f32[4,1,8], index: 8, kind: input, shape index: {}]   ;;  %s1886_s9 = inlined_call_operand.vmem [shape: f32[4,8,32], index: 9, kind: input, shape index: {}]   ;;  %s1887_s10 = inlined_call_operand.vmem [shape: f32[1,32], index: 10, kind: input, shape index: {}]   ;;  %s1888_s11 = inlined_call_operand.hbm [shape: f32[16,32], index: 11, kind: output, shape index: {}]  }
   0x1   :  { %18 = vsyncpa [#allocation4 + $0x1], 0  ;;  %s1662_s17 = smov 0   ;;  %s1664_s18 = smov 0  }
   0x2   :  { %s1666_s19 = smov 0   ;;  %s1668_s20 = smov 0  }
   0x3   :  { %s1670_s21 = smov 0   ;;  %s1672_s22 = smov 0  }
   0x4   :  { %s1674_s23 = smov 0   ;;  %s1676_s24 = smov 0  }
   0x5 LB: > { %1895 = sst [smem:[#allocation6_spill]] %s1575_s19  ;;  %s1275_s25 = sadd.s32 4294967295, %s1595_s24   ;;  %s1595_s24 = sphi %s1676_s24, %s24_s24   ;;  %s1591_s23 = sphi %s1674_s23, %s1911_s23   ;;  %s1587_s22 = sphi %s1672_s22, %s1910_s22   ;;  %s1583_s21 = sphi %s1670_s21, %s1909_s21   ;;  %s1579_s20 = sphi %s1668_s20, %s1908_s20   ;;  %s1575_s19 = sphi %s1666_s19, %s1907_s19   ;;  %s1571_s18 = sphi %s1664_s18, %s1913_s18   ;;  %s1567_s17 = sphi %s1662_s17, %s1912_s17  }
   0x6   : > { %1896 = sst [smem:[#allocation7_spill]] %s1587_s22  ;;  %s1276_s26 = sadd.s32 4294967294, %s1595_s24  }
   0x7   : > { %1897 = sst [smem:[#allocation8_spill]] %s1591_s23  ;;  %s33_s27 = sadd.s32 1, %s1587_s22 }
   0x8   : > { %p34_p0 = scmp.ge.s32.totalorder %s33_s27, 4  ;;  %s36_s28 = sadd.s32 1, %s1591_s23 }
   0x9   : > { %p334_p1 = scmp.ne.s32.totalorder %s1575_s19, %s1571_s18  ;;  %p335_p2 = scmp.eq.s32.totalorder %s1275_s25, 7 }
   0xa   : > { %s1915_s27 = smov (%p34_p0, %s33_s27), 0  ;;  %s1917_s28 = smov (!%p34_p0, %s36_s28), %s1591_s23 }
   0xb   : > { %1898 = sst [smem:[#allocation9_spill]] %s1915_s27  ;;  %p1711_p3 = por %p335_p2, %p334_p1 }
   0xc   : > { %p340_p4 = scmp.ne.s32.totalorder %s1571_s18, %s1567_s17  ;;  %p38_p5 = scmp.ge.s32.totalorder %s1917_s28, 2 }
   0xd   : > { %p341_p6 = scmp.eq.s32.totalorder %s1276_s26, 7  ;;  %p1279_p7 = scmp.ge.s32.totalorder %s1595_s24, 1 }
   0xe   : > { %p436_p8 = scmp.lt.s32.totalorder %s1595_s24, 9  ;;  %s1919_s28 = smov (%p38_p5, %s1917_s28), 0 }
   0xf   : > { %1900 = sst [smem:[#allocation10_spill]] %s1919_s28  ;;  %p1721_p9 = por %p341_p6, %p340_p4 }
  0x10   : > { %p437_p10 = pnand %p1279_p7, %p436_p8  ;;  %s321_s12 = ssub.s32 %s1591_s23, %s1919_s28 }
  0x11   : > { %s1901_s30 = scalar_select %p1721_p9, 1, 0 }
  0x12   : > { %s324_s13 = sadd.s32 1, %s1575_s19  ;;  %p322_p11 = scmp.eq.s32.totalorder %s321_s12, 0  ;;  %v1597_v0 = vmov (!%p437_p10), 0.0|0.0   ;;  %vm1598_vm0 = vmmov (!%p437_p10), 0   ;;  %v1599_v1 = vmov (!%p437_p10), 0.0   ;;  %vm569_vm1 = vcmask (!%p437_p10), 261120  }
  0x13   : > { %1902 = sst [smem:[#allocation11_spill]] %s1901_s30  ;;  %440 = sbr.rel (%p437_p10) target bundleno = 1255 (0x4e7), region = 64  ;;  %1393 = vmatprep.subr.bf16.mxu0 (!%p437_p10), %v1597_v0  ;;  %1349 = vmatprep.mubr.msk.f32.mxu0 (!%p437_p10), %vm1598_vm0, %v1599_v1  ;;  %vm831_vm2 = vcmask (!%p437_p10), 64512   ;;  %vm911_vm4 = vcmask (!%p437_p10), 130048  }
  0x14   : > { %s1729_s14 = scalar_select %p322_p11, %s1575_s19, %s324_s13  }
  0x15   : > { %p529_p12 = scmp.lt.s32.totalorder (!%p437_p10), %s1579_s20, 3  ;;  %s1282_s15 = sshll.u32 (!%p437_p10), %s1583_s21, 1  ;;  %vm1417_vm3 = vmpackc.low (!%p437_p10), %vm831_vm2, %vm831_vm2 }
  0x16   : > { %1903 = sst [smem:[#allocation12_spill]] %s1729_s14  ;;  %p518_p13 = scmp.lt.s32.totalorder (!%p437_p10), %s1282_s15, 3 }
  0x17   : > { %s1893_s16 = sand.u32 (!%p437_p10), 1, %s1571_s18   ;;  %p513_p0 = scmp.lt.s32.totalorder (!%p437_p10), %s1583_s21, 1 }
  0x18   : > { %s1747_s12 = sshll.u32 (!%p437_p10), %s1893_s16, 3  ;;  %p1306_p1 = scmp.ne.s32.totalorder (!%p437_p10), %s1579_s20, 0 }
  0x1a   : > { %s1738_s25 = scalar_select %p529_p12, %s1579_s20, 3 }
  0x1b   : > { %s1921_s15 = smov (!%p518_p13, %s1282_s15), 3  ;;  %v1600_v57 = vmov (!%p1306_p1), 0.0  }
  0x1c   : > { %s1743_s26 = sshll.u32 %s1738_s25, 5  ;;  %s1283_s23 = sshll.u32 %s1921_s15, 3  ;;  %1074 = vst.msk [vmem:[#allocation2] sm:$0xff] (!%p1306_p1), %vm569_vm1, %v1600_v57 }
  0x1d   : > { %s541_s27 = scalar_lea.vmem %s1882_s5, %s1743_s26  ;;  %s521_s19 = scalar_lea.vmem %s1878_s1, %s1283_s23 }
  0x1e   : > { %v645_v2 = vld [vmem:[%s541_s27] sm:$0xff]  ;;  %v646_v3 = vld [vmem:[%s541_s27 + $0x8] sm:$0xff]  ;;  %v647_v4 = vld [vmem:[%s541_s27 + $0x10] sm:$0xff]  ;;  %s533_s28 = scalar_lea.vmem %s1880_s3, %s1743_s26  ;;  %s536_s30 = scalar_lea.vmem %s1881_s4, %s1738_s25 }
  0x1f   : > { %v1399_v5 = vpack.c.bf16 %v646_v3, %v645_v2  ;;  %v648_v6 = vld [vmem:[%s541_s27 + $0x18] sm:$0xff]  ;;  %v643_v7 = vld [vmem:[%s521_s19] sm:$0xff]  ;;  %v559_v10 = vld [vmem:[%s533_s28 + $0x8] sm:$0xff]  ;;  %s514_s22 = scalar_select %p513_p0, %s1583_s21, 1 }
  0x20   : > { %v1403_v8 = vpack.c.bf16 %v648_v6, %v647_v4  ;;  %1360 = vmatprep.mubr.msk.f32.mxu1 %vm569_vm1, %v643_v7  ;;  %v558_v9 = vld [vmem:[%s533_s28] sm:$0xff]  ;;  %v560_v12 = vld [vmem:[%s533_s28 + $0x10] sm:$0xff]  ;;  %v561_v13 = vld [vmem:[%s533_s28 + $0x18] sm:$0xff]  ;;  %s527_s13 = scalar_lea.vmem %s1879_s2, %s1283_s23 }
  0x21   : > { %1400 = vmatprep.subr.bf16.mxu1 %v1399_v5  ;;  %v1394_v11 = vpack.c.bf16 %v559_v10, %v558_v9  ;;  %v1397_v14 = vpack.c.bf16 %v561_v13, %v560_v12  ;;  %s1281_s27 = sshll.u32 %s514_s22, 3  ;;  %v644_v15 = vld [vmem:[%s521_s19 + $0x8] sm:$0xff]  ;;  %s544_s22 = scalar_lea.vmem %s1883_s6, %s1738_s25  ;;  %v1293_v25 = vld [vmem:[%s536_s30] ss:$0 sm:$0xff] }
  0x22   : > { %1402 = vmatpush3.bf16.msra.mxu1 %v1399_v5  ;;  %s516_s16 = scalar_lea.vmem %s1877_s0, %s1281_s27  ;;  %v1295_v17 = vld [vmem:[%s544_s22] ss:$0 sm:$0xff]  ;;  %s549_s19 = scalar_lea.vmem %s1884_s7, %s1743_s26  ;;  %v738_v34 = vld [vmem:[%s527_s13 + $0x8] sm:$0xff] }
  0x23   : > { %1404 = vmatprep.subr.bf16.mxu1 %v1403_v8  ;;  %1395 = vmatpush3.bf16.msra.mxu0 %v1394_v11  ;;  %v557_v16 = vld [vmem:[%s516_s16] sm:$0xff]  ;;  %v740_v29 = vld [vmem:[%s549_s19 + $0x8] sm:$0xff]  ;;  %v741_v30 = vld [vmem:[%s549_s19 + $0x10] sm:$0xff]  ;;  %s552_s26 = scalar_lea.vmem %s1885_s8, %s1738_s25  ;;  %s1292_s27 = sshll.u32 %s1738_s25, 3 }
  0x24   : > { %1396 = vmatprep.subr.bf16.mxu0 %v1597_v0  ;;  %v737_v27 = vld [vmem:[%s527_s13] sm:$0xff]  ;;  %v742_v32 = vld [vmem:[%s549_s19 + $0x18] sm:$0xff]  ;;  %s556_s16 = scalar_lea.vmem %s1886_s9, %s1292_s27  ;;  %s512_s13 = scalar_lea.vmem [#allocation3], %s1747_s12 }
  0x25   : > { %v739_v28 = vld [vmem:[%s549_s19] sm:$0xff]  ;;  %v1411_v33 = vpack.c.bf16 %v742_v32, %v741_v30 }
  0x26   : > { %1406 = vmatpush3.bf16.msra.mxu1 %v1403_v8  ;;  %v1407_v31 = vpack.c.bf16 %v740_v29, %v739_v28  ;;  %v1298_v44 = vld [vmem:[%s552_s26] ss:$0 sm:$0xff] }
  0x27   : > { %1398 = vmatpush3.bf16.msra.mxu0 %v1397_v14  ;;  %1415 = vmatprep.subr.bf16.mxu1 %v1597_v0  ;;  %v996_v49 = vld [vmem:[%s556_s16] sm:$0xff] }
  0x28   : > { %1408 = vmatprep.subr.bf16.mxu0 %v1407_v31 }
  0x29   : > { %1361 = vmatmul.mubr.msk.f32.vlgmr.msra.gmra.mrb[0].mxu1 %vm569_vm1, %v644_v15 }
  0x2a   : > { %1350 = vmatmul.mubr.msk.f32.vlgmr.msra.gmra.mrb[0].mxu0 %vm569_vm1, %v557_v16  ;;  %1378 = vmatprep.mubr.msk.f32.mxu1 %vm1598_vm0, %v1599_v1 }
  0x2b   : > { %1371 = vmatprep.mubr.msk.f32.mxu0 %vm569_vm1, %v737_v27  ;;  %1410 = vmatpush3.bf16.msra.mxu0 %v1407_v31 }
  0x2c   : > { %1412 = vmatprep.subr.bf16.mxu0 %v1411_v33 }
  0x2f   : > { %1414 = vmatpush3.bf16.msra.mxu0 %v1411_v33 }
  0x30   : > { %1419 = vmatprep.subr.bf16.mxu0 %v1597_v0 }
  0x32   : > { %1372 = vmatmul.mubr.msk.f32.vlgmr.msra.gmra.mrb[2].mxu0 %vm569_vm1, %v738_v34 }
  0x33   : > { %1385 = vmatprep.mubr.msk.f32.mxu0 %vm1598_vm0, %v1599_v1 }
  0xfc   : > { %v1362_v18 = vpop.f32.mrb[0].mxu1 }
  0xfd   : > { %v734_v19 = vadd.f32 %v1362_v18, %v1295_v17  ;;  %v728_v20 = vpop.f32.mrb[1].mxu1  ;;  %v639_v21 = vpop.f32.mrb[0].mxu0 }
  0xfe   : > { %v729_v22 = vadd.f32 %v1295_v17, %v728_v20  ;;  %v1351_v23 = vpop.f32.mrb[1].mxu0  ;;  %v640_v26 = vadd.f32 %v1293_v25, %v639_v21 }
 0x100   : > { %v1416_v24 = vpack.c.bf16 %v734_v19, %v729_v22 }
 0x102   : > { %1418 = vmatpush3.bf16.xpose.msk.msra.mxu1 %vm1417_vm3, %v1416_v24 }
 0x103   : > { %1388 = vmatprep.subr.mxu1 %v1599_v1 }
 0x105   : > { %v1373_v43 = vpop.f32.mrb[2].mxu0 }
 0x106   : > { %v822_v45 = vpop.f32.mrb[3].mxu0  ;;  %v828_v46 = vadd.f32 %v1373_v43, %v1298_v44 }
 0x107   : > { %v823_v47 = vadd.f32 %v1298_v44, %v822_v45 }
 0x109   : > { %1379 = vmatmul.mubr.msk.f32.vlgmr.msra.gmra.mrb[2].mxu1 %vm831_vm2, %v640_v26  ;;  %v1420_v48 = vpack.c.bf16 %v828_v46, %v823_v47 }
 0x10a   : > { %1390 = vmatprep.mubr.msk.f32.mxu1 %vm1598_vm0, %v1599_v1  ;;  %1389 = vmatpush3.msra.mxu1 %v996_v49 }
 0x10b   : > { %1421 = vmatpush3.bf16.msra.mxu0 %v1420_v48 }
 0x1dc   : > { %v907_v35 = vpop.f32.mrb[2].mxu1 }
 0x1dd   : > { %v1380_v36 = vpop.f32.mrb[3].mxu1  ;;  %v912_v37 = vsel %vm911_vm4, %v907_v35, -inf }
 0x1de   : > { %913 = vmax.xlane.f32.xlu0 %v912_v37 }
 0x26b   : > { %v914_v38 = vpop.xlane.xlu0 %913 }
 0x26c   : > { %v915_v39 = vsub.f32 %v907_v35, %v914_v38 }
 0x26e   : > { %v916_v40 = vmul.f32 1.442695, %v915_v39 }
 0x270   : > { %1497 = vpow2.f32 %v916_v40 }
 0x27a   : > { %v1498_v41 = vpop.eup %1497 }
 0x27b   : > { %v918_v42 = vsel %vm911_vm4, %v1498_v41, 0.0 }
 0x27c   : > { %919 = vadd.xlane.f32.xlu0 %v918_v42 }
 0x309   : > { %v920_v50 = vpop.xlane.xlu0 %919 }
 0x30a   : > { %1499 = vrcp.f32 %v920_v50 }
 0x314   : > { %v1500_v51 = vpop.eup %1499 }
 0x315   : > { %v922_v52 = vmul.f32 %v1500_v51, %v1498_v41 }
 0x317   : > { %1386 = vmatmul.mubr.msk.f32.vlgmr.msra.gmra.mrb[4].mxu0 %vm911_vm4, %v922_v52 }
 0x3ea   : > { %v992_v53 = vpop.f32.mrb[4].mxu0 }
 0x3eb   : > { %v1387_v54 = vpop.f32.mrb[5].mxu0  ;;  %1391 = vmatmul.mubr.msk.f32.vlgmr.msra.gmra.mrb[4].mxu1 %vm831_vm2, %v992_v53 }
 0x4b9   : > { %1073 = sbr.rel (%p1306_p1) target bundleno = 1216 (0x4c0), region = 68 }
 0x4be   : > { %v1066_v55 = vpop.f32.mrb[4].mxu1 }
 0x4bf   : > { %v1392_v56 = vpop.f32.mrb[5].mxu1 }
 0x4c0 PF: > { %v1075_v58 = vld [vmem:[#allocation2] sm:$0xff]  ;;  %p1307_p2 = scmp.ne.s32.totalorder %s1579_s20, 3 }
 0x4c1   : > { %v1076_v59 = vadd.f32 %v1075_v58, %v1066_v55  ;;  %v1308_v61 = vld [vmem:[%s1887_s10] ss:$0 sm:$0xff] (!%p1307_p2) }
 0x4c2   : > { %1081 = sbr.rel (%p1307_p2) target bundleno = 1230 (0x4ce), region = 72 }
 0x4c3   : > { %1077 = vst.msk [vmem:[#allocation2] sm:$0xff] %vm569_vm1, %v1076_v59 }
 0x4ca   : > { %v1082_v60 = vld [vmem:[#allocation2] sm:$0xff] }
 0x4cb   : > { %v1090_v62 = vadd.f32 %v1308_v61, %v1082_v60 }
 0x4cd   : > { %1091 = vst.msk [vmem:[%s512_s13] sm:$0xff] %vm569_vm1, %v1090_v62 }
 0x4ce PF: > { %s1310_s12 = sshll.u32 %s1583_s21, 7  ;;  %s1106_s20 = sshll.u32 %s512_s13, 4  ;;  %s1107_s20 = int_to_ptr.vmem [resolvable:$true] %s1106_s20 }
 0x4cf   : > { %s1828_s23 = scalar_lea.hbm %s1888_s11, %s1310_s12  ;;  %s1904_s15 = sand.u32 1, %s1571_s18  }
 0x4d0   : > { %s1093_s26 = scalar_lea.sflag [#allocation4], %s1904_s15  ;;  %s1501_s27 = scalar_lea.vmem %s1107_s20, 128 }
 0x4d1   : > { %p1502_p4 = scmp.ne.s32.totalorder %s1107_s20, %s1501_s27  ;;  %s1601_s30 = smov [#allocation3]  }
 0x4d2   : > { %s1505_s14 = sshll.u32 %s1601_s30, 4  ;;  %s1506_s14 = int_to_ptr.vmem [resolvable:$false] %s1505_s14 }
 0x4d3   : > { %p1503_p5 = pnand %p1502_p4, %p1711_p3  ;;  %s1507_s16 = scalar_lea.vmem %s1506_s14, 256 }
 0x4d4   : > { %p1508_p7 = scmp.lt.s32.totalorder %s1107_s20, %s1506_s14  ;;  %p1509_p8 = scmp.lt.s32.totalorder %s1507_s16, %s1501_s27 }
 0x4d5   : > { %p1504_p6 = pneg %p1503_p5 }
 0x4d6   : > { %p1510_p10 = por %p1509_p8, %p1508_p7 }
 0x4d8   : > { %p1511_p11 = pnand %p1510_p10, %p1504_p6 }
 0x4da   : > { %1514 = shalt.err (!%p1511_p11)
}
 0x4db   : > { %s1515_s21 = scalar_lea.hbm %s1828_s23, 128  ;;  %s1519_s28 = scalar_lea.hbm %s1888_s11, 256 }
 0x4dc   : > { %p1516_p12 = scmp.ne.s32.totalorder %s1828_s23, %s1515_s21  ;;  %p1520_p1 = scmp.lt.u32.totalorder %s1828_s23, %s1888_s11 }
 0x4dd   : > { %p1521_p2 = scmp.lt.u32.totalorder %s1519_s28, %s1515_s21  ;;  %p1523_p5 = scmp.lt.u32.totalorder %s1515_s21, %s1828_s23 }
 0x4de   : > { %p1517_p13 = pnand %p1516_p12, %p1711_p3 }
 0x4df   : > { %p1522_p4 = por %p1521_p2, %p1520_p1 }
 0x4e0   : > { %p1518_p0 = pneg %p1517_p13 }
 0x4e1   : > { %p1524_p6 = por %p1523_p5, %p1522_p4 }
 0x4e3   : > { %p1525_p7 = pnand %p1524_p6, %p1518_p0 }
 0x4e5   : > { %1528 = shalt.err (!%p1525_p7)
}
 0x4e6   : > { %1422 = dma.vmem_to_hbm [thread:$0]  (%p1711_p3), %s1107_s20, 128, %s1828_s23, %s1093_s26  }
 0x4e7 PF: > { %p1428_p8 = scmp.ge.s32.totalorder %s1595_s24, 2  ;;  %s1118_s15 = sand.u32 1, %s1567_s17  }
 0x4e8   : > { %s1119_s27 = scalar_lea.sflag [#allocation4], %s1118_s15 }
 0x4e9   : > { %p1425_p10 = pnand %p1428_p8, %p1721_p9 }
 0x4eb   : > { %1562 = dma.done.wait (!%p1425_p10), %s1119_s27, 128  }
 0x4ec   : > { %1564 = vsyncadd (!%p1425_p10), %s1119_s27, 4294967168  ;;  %s24_s24 = sadd.s32 1, %s1595_s24   ;;  %s1906_s30 = sld [smem:[#allocation6_spill]] }
 0x4ed   : > { %p21_p11 = scmp.ge.s32.totalorder %s24_s24, 10   ;;  %s1907_s19 = sld [smem:[#allocation12_spill]] }
 0x4ee   : > { %s1908_s20 = sld [smem:[#allocation7_spill]]  ;;  %s1909_s21 = sld [smem:[#allocation8_spill]] }
 0x4ef   : > { %s1910_s22 = sld [smem:[#allocation9_spill]]  ;;  %s1911_s23 = sld [smem:[#allocation10_spill]] }
 0x4f0   : > { %s1912_s17 = smov %s1571_s18  ;;  %23 = sbr.rel (!%p21_p11) target bundleno = 5 (0x5), region = 134 }
 0x4f2   : > { %s1913_s18 = smov %s1906_s30 }
 0x4f7   :  { %1124 = vsyncpa [#allocation4], 1 }
 0x4f8   :  { %1126 = vsyncpa [#allocation4 + $0x1], 1 }

</bundles_post_ra>
